<compile_context>
chip_gen: v7x
topology: tpu7x:2x2x1
jax: 0.10.0
libtpu: 0.0.40
codegen_flags: <defaults>
</compile_context>

<pallas_src>
import math

import jax
import jax.numpy as jnp
from jax.experimental import pallas as pl
from jax.experimental.pallas import tpu as pltpu


# ---------------------------------------------------------------------------
# kernel
# ---------------------------------------------------------------------------
def _make_kernel(n):
    def kernel(w_ref, *refs):
        # w_ref : (N,) f32 softmax weights, scalar-prefetched (SMEM)
        # refs  : n input tiles (tr, lane) + 1 output tile (tr, lane) f32
        out_ref = refs[n]
        acc = w_ref[0] * refs[0][...].astype(jnp.float32)
        for i in range(1, n):  # unrolled at trace time
            acc = acc + w_ref[i] * refs[i][...].astype(jnp.float32)
        out_ref[...] = jnp.maximum(acc, 0.0).astype(out_ref.dtype)

    return kernel


# ---------------------------------------------------------------------------
# tiling helpers
# ---------------------------------------------------------------------------
_SUBLANE = {4: 8, 2: 16, 1: 32}  # itemsize -> packed sublane multiple


def _round_up(x, m):
    return ((x + m - 1) // m) * m


def _round_down(x, m):
    return x - (x % m)


def _widest_lane(total):
    """Widest lane (multiple of 128, <= 4096) that exactly divides total."""
    assert total % 128 == 0
    k = total // 128
    for g in range(min(32, k), 0, -1):
        if k % g == 0:
            return 128 * g
    return 128


def _choose_tiling(total, n, in_dtype, vmem_budget_bytes, min_steps=8):
    itemsize = jnp.dtype(in_dtype).itemsize
    sub = _SUBLANE.get(itemsize, 8)

    lane = _widest_lane(total)
    rows = total // lane

    # Per tile-row the pipeline holds 2x (double-buffer) n input rows plus
    # one f32 output row.
    bytes_per_row = 2 * lane * (n * itemsize + 4)
    max_tr = max(1, vmem_budget_bytes // bytes_per_row)

    # Keep at least ~min_steps grid steps so DMA/compute overlap (and v7x
    # core sharding) have something to work with.
    steps_cap = _round_up(max(1, -(-rows // min_steps)), sub)

    tr = min(rows, max_tr, steps_cap)
    tr = max(sub, _round_down(tr, sub))   # sublane-aligned block
    tr = min(tr, rows)                    # block == full dim is always legal
    return lane, rows, tr


def _device_kind():
    try:
        return jax.devices()[0].device_kind.lower()
    except Exception:  # pragma: no cover - defensive
        return ""


# ---------------------------------------------------------------------------
# wrapper
# ---------------------------------------------------------------------------
def connection_combination(prevs, betas, *, vmem_budget_bytes=None):
    """prevs: list/tuple of N arrays with identical shape (e.g. B,C,H,W).
       betas: (N,) array.  Returns relu(sum_i softmax(betas)[i] * prevs[i]) in f32."""
    n = len(prevs)
    assert n >= 1 and betas.shape[-1] == n
    out_shape = prevs[0].shape
    in_dtype = prevs[0].dtype
    in_itemsize = jnp.dtype(in_dtype).itemsize
    total = int(math.prod(out_shape))

    kind = _device_kind()
    is_v7 = "v7" in kind
    if vmem_budget_bytes is None:
        # v7x has 64 MiB physical VMEM per TC; v5e/v6e have 128 MiB.
        vmem_budget_bytes = (40 << 20) if is_v7 else (64 << 20)
    vmem_physical_cap = (64 << 20) if is_v7 else (128 << 20)

    # Lane-dense flat view.  Reshape of a contiguous row-major array is free;
    # padding (a real copy) only happens for totals not divisible by 128.
    pad = 0
    total_p = total
    if total % 128 != 0:
        total_p = _round_up(total, 512)
        pad = total_p - total

    lane, rows, tr = _choose_tiling(total_p, n, in_dtype, vmem_budget_bytes)

    def _as_flat(p):
        if pad:
            p = jnp.pad(p.reshape(total), (0, pad))
        return p.reshape(rows, lane)

    prevs_flat = [_as_flat(p) for p in prevs]

    # Softmax hoisted out of the kernel: computed once, N scalars into SMEM.
    weights = jax.nn.softmax(betas.astype(jnp.float32), axis=-1)  # (N,)

    grid_steps = pl.cdiv(rows, tr)

    # Tie the compiler VMEM limit to the actual pipeline footprint.
    footprint = 2 * tr * lane * (n * in_itemsize + 4)
    vmem_limit = min(footprint + (4 << 20), vmem_physical_cap)

    # v7x: shard the row axis across the two TensorCores; elsewhere "parallel".
    core_parallel = getattr(pltpu, "CORE_PARALLEL", None)
    if is_v7 and grid_steps >= 2 and core_parallel is not None:
        dim_sem = (core_parallel,)
    else:
        dim_sem = ("parallel",)

    block_spec = pl.BlockSpec((tr, lane), lambda r, w: (r, 0))

    out = pl.pallas_call(
        _make_kernel(n),
        out_shape=jax.ShapeDtypeStruct((rows, lane), jnp.float32),
        grid_spec=pltpu.PrefetchScalarGridSpec(
            num_scalar_prefetch=1,                         # weights -> SMEM
            grid=(grid_steps,),
            in_specs=[pl.BlockSpec((tr, lane), lambda r, w: (r, 0))
                      for _ in range(n)],
            out_specs=block_spec,
        ),
        compiler_params=pltpu.CompilerParams(
            dimension_semantics=dim_sem,
            vmem_limit_bytes=int(vmem_limit),
        ),
        cost_estimate=pl.CostEstimate(
            flops=2 * n * total,
            transcendentals=0,
            bytes_accessed=n * total * in_itemsize + total * 4,
        ),
    )(weights, *prevs_flat)

    out = out.reshape(total_p)
    if pad:
        out = out[:total]
    return out.reshape(out_shape)


# ---------------------------------------------------------------------------
# reference + driver
# ---------------------------------------------------------------------------
def _reference(prevs, betas):
    w = jax.nn.softmax(betas.astype(jnp.float32), axis=-1)
    mix = 0.0
    for i in range(len(prevs)):
        mix = mix + w[i] * prevs[i].astype(jnp.float32)
    return jnp.maximum(mix, 0.0)


if __name__ == "__main__":
    key = jax.random.PRNGKey(0)
    N = 8                      # "8 nodes of part"
    B, C, H, W = 2, 4, 16, 16  # small NCHW shapes

    keys = jax.random.split(key, N + 1)
    prevs = [jax.random.normal(keys[i], (B, C, H, W), dtype=jnp.float32)
             for i in range(N)]
    betas = jax.random.normal(keys[N], (N,), dtype=jnp.float32)

    out = connection_combination(prevs, betas)
    out = jax.block_until_ready(out)

    ref = _reference(prevs, betas)
    assert out.shape == (B, C, H, W)
    assert out.dtype == jnp.float32
    assert jnp.allclose(out, ref, atol=1e-5, rtol=1e-5), "mismatch vs reference"

    print("KERNEL_OK")
</pallas_src>

<mosaic_0001>
module attributes {stable_mosaic.version = 11 : i64} {
  func.func @kernel(%arg0: i32, %arg1: memref<8xf32, #tpu.memory_space<smem>>, %arg2: memref<1x2048xf32, #tpu.memory_space<vmem>>, %arg3: memref<1x2048xf32, #tpu.memory_space<vmem>>, %arg4: memref<1x2048xf32, #tpu.memory_space<vmem>>, %arg5: memref<1x2048xf32, #tpu.memory_space<vmem>>, %arg6: memref<1x2048xf32, #tpu.memory_space<vmem>>, %arg7: memref<1x2048xf32, #tpu.memory_space<vmem>>, %arg8: memref<1x2048xf32, #tpu.memory_space<vmem>>, %arg9: memref<1x2048xf32, #tpu.memory_space<vmem>>, %arg10: memref<1x2048xf32, #tpu.memory_space<vmem>>) attributes {dimension_semantics = [#tpu.dimension_semantics<parallel>], iteration_bounds = array<i64: 1>, scalar_prefetch = 1 : i64, scratch_operands = 0 : i64, tpu.core_type = #tpu.core_type<tc>, window_params = [{transform_indices = @transform_0, window_bounds = array<i64: 1, 2048>}, {transform_indices = @transform_1, window_bounds = array<i64: 1, 2048>}, {transform_indices = @transform_2, window_bounds = array<i64: 1, 2048>}, {transform_indices = @transform_3, window_bounds = array<i64: 1, 2048>}, {transform_indices = @transform_4, window_bounds = array<i64: 1, 2048>}, {transform_indices = @transform_5, window_bounds = array<i64: 1, 2048>}, {transform_indices = @transform_6, window_bounds = array<i64: 1, 2048>}, {transform_indices = @transform_7, window_bounds = array<i64: 1, 2048>}, {transform_indices = @transform_8, window_bounds = array<i64: 1, 2048>}]} {
    %c0 = arith.constant 0 : index
    %0 = memref.load %arg1[%c0] : memref<8xf32, #tpu.memory_space<smem>>
    %c0_0 = arith.constant 0 : index
    %c0_1 = arith.constant 0 : index
    %1 = vector.load %arg2[%c0_0, %c0_1] : memref<1x2048xf32, #tpu.memory_space<vmem>>, vector<1x2048xf32>
    %2 = vector.broadcast %0 : f32 to vector<1x2048xf32>
    %3 = arith.mulf %2, %1 : vector<1x2048xf32>
    %c1 = arith.constant 1 : index
    %4 = memref.load %arg1[%c1] : memref<8xf32, #tpu.memory_space<smem>>
    %c0_2 = arith.constant 0 : index
    %c0_3 = arith.constant 0 : index
    %5 = vector.load %arg3[%c0_2, %c0_3] : memref<1x2048xf32, #tpu.memory_space<vmem>>, vector<1x2048xf32>
    %6 = vector.broadcast %4 : f32 to vector<1x2048xf32>
    %7 = arith.mulf %6, %5 : vector<1x2048xf32>
    %8 = arith.addf %3, %7 : vector<1x2048xf32>
    %c2 = arith.constant 2 : index
    %9 = memref.load %arg1[%c2] : memref<8xf32, #tpu.memory_space<smem>>
    %c0_4 = arith.constant 0 : index
    %c0_5 = arith.constant 0 : index
    %10 = vector.load %arg4[%c0_4, %c0_5] : memref<1x2048xf32, #tpu.memory_space<vmem>>, vector<1x2048xf32>
    %11 = vector.broadcast %9 : f32 to vector<1x2048xf32>
    %12 = arith.mulf %11, %10 : vector<1x2048xf32>
    %13 = arith.addf %8, %12 : vector<1x2048xf32>
    %c3 = arith.constant 3 : index
    %14 = memref.load %arg1[%c3] : memref<8xf32, #tpu.memory_space<smem>>
    %c0_6 = arith.constant 0 : index
    %c0_7 = arith.constant 0 : index
    %15 = vector.load %arg5[%c0_6, %c0_7] : memref<1x2048xf32, #tpu.memory_space<vmem>>, vector<1x2048xf32>
    %16 = vector.broadcast %14 : f32 to vector<1x2048xf32>
    %17 = arith.mulf %16, %15 : vector<1x2048xf32>
    %18 = arith.addf %13, %17 : vector<1x2048xf32>
    %c4 = arith.constant 4 : index
    %19 = memref.load %arg1[%c4] : memref<8xf32, #tpu.memory_space<smem>>
    %c0_8 = arith.constant 0 : index
    %c0_9 = arith.constant 0 : index
    %20 = vector.load %arg6[%c0_8, %c0_9] : memref<1x2048xf32, #tpu.memory_space<vmem>>, vector<1x2048xf32>
    %21 = vector.broadcast %19 : f32 to vector<1x2048xf32>
    %22 = arith.mulf %21, %20 : vector<1x2048xf32>
    %23 = arith.addf %18, %22 : vector<1x2048xf32>
    %c5 = arith.constant 5 : index
    %24 = memref.load %arg1[%c5] : memref<8xf32, #tpu.memory_space<smem>>
    %c0_10 = arith.constant 0 : index
    %c0_11 = arith.constant 0 : index
    %25 = vector.load %arg7[%c0_10, %c0_11] : memref<1x2048xf32, #tpu.memory_space<vmem>>, vector<1x2048xf32>
    %26 = vector.broadcast %24 : f32 to vector<1x2048xf32>
    %27 = arith.mulf %26, %25 : vector<1x2048xf32>
    %28 = arith.addf %23, %27 : vector<1x2048xf32>
    %c6 = arith.constant 6 : index
    %29 = memref.load %arg1[%c6] : memref<8xf32, #tpu.memory_space<smem>>
    %c0_12 = arith.constant 0 : index
    %c0_13 = arith.constant 0 : index
    %30 = vector.load %arg8[%c0_12, %c0_13] : memref<1x2048xf32, #tpu.memory_space<vmem>>, vector<1x2048xf32>
    %31 = vector.broadcast %29 : f32 to vector<1x2048xf32>
    %32 = arith.mulf %31, %30 : vector<1x2048xf32>
    %33 = arith.addf %28, %32 : vector<1x2048xf32>
    %c7 = arith.constant 7 : index
    %34 = memref.load %arg1[%c7] : memref<8xf32, #tpu.memory_space<smem>>
    %c0_14 = arith.constant 0 : index
    %c0_15 = arith.constant 0 : index
    %35 = vector.load %arg9[%c0_14, %c0_15] : memref<1x2048xf32, #tpu.memory_space<vmem>>, vector<1x2048xf32>
    %36 = vector.broadcast %34 : f32 to vector<1x2048xf32>
    %37 = arith.mulf %36, %35 : vector<1x2048xf32>
    %38 = arith.addf %33, %37 : vector<1x2048xf32>
    %cst = arith.constant 0.000000e+00 : f32
    %39 = vector.broadcast %cst : f32 to vector<1x2048xf32>
    %40 = arith.maximumf %38, %39 : vector<1x2048xf32>
    %c0_16 = arith.constant 0 : index
    %c0_17 = arith.constant 0 : index
    %41 = vector.load %arg10[%c0_16, %c0_17] : memref<1x2048xf32, #tpu.memory_space<vmem>>, vector<1x2048xf32>
    tpu.vector_store %arg10[%c0_16, %c0_17], %40 {strides = array<i32>} : memref<1x2048xf32, #tpu.memory_space<vmem>>, vector<1x2048xf32>,
    return
  }
  func.func @transform_0(%arg0: i32, %arg1: memref<8xf32, #tpu.memory_space<smem>>) -> (i32, i32) {
    %c0_i32 = arith.constant 0 : i32
    %c0_i32_0 = arith.constant 0 : i32
    return %arg0, %c0_i32 : i32, i32
  }
  func.func @transform_1(%arg0: i32, %arg1: memref<8xf32, #tpu.memory_space<smem>>) -> (i32, i32) {
    %c0_i32 = arith.constant 0 : i32
    %c0_i32_0 = arith.constant 0 : i32
    return %arg0, %c0_i32 : i32, i32
  }
  func.func @transform_2(%arg0: i32, %arg1: memref<8xf32, #tpu.memory_space<smem>>) -> (i32, i32) {
    %c0_i32 = arith.constant 0 : i32
    %c0_i32_0 = arith.constant 0 : i32
    return %arg0, %c0_i32 : i32, i32
  }
  func.func @transform_3(%arg0: i32, %arg1: memref<8xf32, #tpu.memory_space<smem>>) -> (i32, i32) {
    %c0_i32 = arith.constant 0 : i32
    %c0_i32_0 = arith.constant 0 : i32
    return %arg0, %c0_i32 : i32, i32
  }
  func.func @transform_4(%arg0: i32, %arg1: memref<8xf32, #tpu.memory_space<smem>>) -> (i32, i32) {
    %c0_i32 = arith.constant 0 : i32
    %c0_i32_0 = arith.constant 0 : i32
    return %arg0, %c0_i32 : i32, i32
  }
  func.func @transform_5(%arg0: i32, %arg1: memref<8xf32, #tpu.memory_space<smem>>) -> (i32, i32) {
    %c0_i32 = arith.constant 0 : i32
    %c0_i32_0 = arith.constant 0 : i32
    return %arg0, %c0_i32 : i32, i32
  }
  func.func @transform_6(%arg0: i32, %arg1: memref<8xf32, #tpu.memory_space<smem>>) -> (i32, i32) {
    %c0_i32 = arith.constant 0 : i32
    %c0_i32_0 = arith.constant 0 : i32
    return %arg0, %c0_i32 : i32, i32
  }
  func.func @transform_7(%arg0: i32, %arg1: memref<8xf32, #tpu.memory_space<smem>>) -> (i32, i32) {
    %c0_i32 = arith.constant 0 : i32
    %c0_i32_0 = arith.constant 0 : i32
    return %arg0, %c0_i32 : i32, i32
  }
  func.func @transform_8(%arg0: i32, %arg1: memref<8xf32, #tpu.memory_space<smem>>) -> (i32, i32) {
    %c0_i32 = arith.constant 0 : i32
    %c0_i32_0 = arith.constant 0 : i32
    return %arg0, %c0_i32 : i32, i32
  }
}

</mosaic_0001>

<bundles_post_ra>
// kernel: tpu_custom_call.1
= control target key start
LH: loop header
LB: loop body
LE: loop exit
PB: predicated region body
PF: predicated region fallthrough
CT: control target
= control target key end

     0   :  { %s605_s0 = inlined_call_operand.hbm [shape: f32[8], index: 0, kind: input, shape index: {}]   ;;  %s606_s1 = inlined_call_operand.hbm [shape: f32[1,2048], index: 1, kind: input, shape index: {}]   ;;  %s607_s2 = inlined_call_operand.hbm [shape: f32[1,2048], index: 2, kind: input, shape index: {}]   ;;  %s608_s3 = inlined_call_operand.hbm [shape: f32[1,2048], index: 3, kind: input, shape index: {}]   ;;  %s609_s4 = inlined_call_operand.hbm [shape: f32[1,2048], index: 4, kind: input, shape index: {}]   ;;  %s610_s5 = inlined_call_operand.vmem [shape: f32[1,2048], index: 5, kind: input, shape index: {}]   ;;  %s611_s6 = inlined_call_operand.hbm [shape: f32[1,2048], index: 6, kind: input, shape index: {}]   ;;  %s612_s7 = inlined_call_operand.hbm [shape: f32[1,2048], index: 7, kind: input, shape index: {}]   ;;  %s613_s8 = inlined_call_operand.hbm [shape: f32[1,2048], index: 8, kind: input, shape index: {}]   ;;  %s614_s9 = inlined_call_operand.hbm [shape: f32[1,2048], index: 9, kind: output, shape index: {}]  }
   0x1   :  { %s216_s11 = scalar_lea.hbm %s605_s0, 16 }
   0x2   :  { %p217_p0 = scmp.ne.s32.totalorder %s605_s0, %s216_s11  ;;  %p220_p1 = scmp.lt.u32.totalorder %s216_s11, %s605_s0 }
   0x4   :  { %p222_p2 = pnand %p220_p1, %p217_p0 }
   0x6   :  { %225 = shalt.err (!%p222_p2)  }
   0x7   :  { %s414_s16 = smov [#allocation3]  }
   0x8   :  { %15 = dma.hbm_to_smem %s605_s0, 16, %s414_s16, [#allocation2] }
   0x9   :  { %402 = dma.done.wait [#allocation2], 16 }
   0xa   :  { %403 = vsyncadd [#allocation2], 4294967280 }
   0xb   :  { %17 = sfence }
   0xc   :  { %18 = vsyncpa [#allocation5], 0 }
   0xd   :  { %19 = vsyncpa [#allocation8], 0 }
   0xe   :  { %20 = vsyncpa [#allocation11], 0 }
   0xf   :  { %21 = vsyncpa [#allocation14], 0 }
  0x10   :  { %22 = vsyncpa [#allocation6], 0  ;;  %s415_s19 = smov [#allocation7]   ;;  %s416_s21 = smov [#allocation10]  }
  0x11   :  { %s39_s20 = sshll.u32 %s415_s19, 4  ;;  %s59_s22 = sshll.u32 %s416_s21, 4  ;;  %s40_s20 = int_to_ptr.vmem [resolvable:$true] %s39_s20  ;;  %s60_s22 = int_to_ptr.vmem [resolvable:$true] %s59_s22 }
  0x12   :  { %s226_s25 = scalar_lea.hbm %s607_s2, 256 }
  0x13   :  { %p227_p3 = scmp.ne.s32.totalorder %s607_s2, %s226_s25  ;;  %p230_p4 = scmp.lt.u32.totalorder %s226_s25, %s607_s2 }
  0x15   :  { %p232_p5 = pnand %p230_p4, %p227_p3 }
  0x17   :  { %235 = shalt.err (!%p232_p5)
}
  0x18   :  { %s236_s29 = scalar_lea.vmem %s40_s20, 256  ;;  %p241_p7 = scmp.lt.s32.totalorder %s40_s20, %s40_s20 }
  0x19   :  { %p237_p6 = scmp.ne.s32.totalorder %s40_s20, %s236_s29  ;;  %p242_p8 = scmp.lt.s32.totalorder %s236_s29, %s236_s29 }
  0x1b   :  { %p243_p9 = por %p242_p8, %p241_p7 }
  0x1d   :  { %p244_p10 = pnand %p243_p9, %p237_p6 }
  0x1f   :  { %247 = shalt.err (!%p244_p10)
}
  0x20   :  { %42 = dma.hbm_to_vmem [thread:$0]  %s607_s2, 256, %s40_s20, [#allocation8]  }
  0x21   :  { %s248_s13 = scalar_lea.hbm %s609_s4, 256 }
  0x22   :  { %p249_p11 = scmp.ne.s32.totalorder %s609_s4, %s248_s13  ;;  %p252_p12 = scmp.lt.u32.totalorder %s248_s13, %s609_s4 }
  0x24   :  { %p254_p13 = pnand %p252_p12, %p249_p11 }
  0x26   :  { %257 = shalt.err (!%p254_p13)
}
  0x27   :  { %s258_s18 = scalar_lea.vmem %s60_s22, 256  ;;  %p263_p1 = scmp.lt.s32.totalorder %s60_s22, %s60_s22 }
  0x28   :  { %p259_p0 = scmp.ne.s32.totalorder %s60_s22, %s258_s18  ;;  %p264_p2 = scmp.lt.s32.totalorder %s258_s18, %s258_s18 }
  0x2a   :  { %p265_p3 = por %p264_p2, %p263_p1 }
  0x2c   :  { %p266_p4 = pnand %p265_p3, %p259_p0 }
  0x2e   :  { %269 = shalt.err (!%p266_p4)
}
  0x2f   :  { %62 = dma.hbm_to_vmem [thread:$0]  %s609_s4, 256, %s60_s22, [#allocation11]  }
  0x30   :  { %s417_s20 = smov [#allocation13]   ;;  %s418_s23 = smov [#allocation4]  }
  0x31   :  { %s81_s21 = sshll.u32 %s417_s20, 4  ;;  %s29_s24 = sshll.u32 %s418_s23, 4  ;;  %s82_s21 = int_to_ptr.vmem [resolvable:$true] %s81_s21  ;;  %s30_s24 = int_to_ptr.vmem [resolvable:$true] %s29_s24 }
  0x32   :  { %s270_s0 = scalar_lea.hbm %s612_s7, 256 }
  0x33   :  { %p271_p5 = scmp.ne.s32.totalorder %s612_s7, %s270_s0  ;;  %p274_p6 = scmp.lt.u32.totalorder %s270_s0, %s612_s7 }
  0x35   :  { %p276_p7 = pnand %p274_p6, %p271_p5 }
  0x37   :  { %279 = shalt.err (!%p276_p7)
}
  0x38   :  { %s280_s4 = scalar_lea.vmem %s82_s21, 256  ;;  %p285_p9 = scmp.lt.s32.totalorder %s82_s21, %s82_s21 }
  0x39   :  { %p281_p8 = scmp.ne.s32.totalorder %s82_s21, %s280_s4  ;;  %p286_p10 = scmp.lt.s32.totalorder %s280_s4, %s280_s4 }
  0x3b   :  { %p287_p11 = por %p286_p10, %p285_p9 }
  0x3d   :  { %p288_p12 = pnand %p287_p11, %p281_p8 }
  0x3f   :  { %291 = shalt.err (!%p288_p12)
}
  0x40   :  { %84 = dma.hbm_to_vmem [thread:$0]  %s612_s7, 256, %s82_s21, [#allocation14]  }
  0x41   :  { %s292_s13 = scalar_lea.hbm %s606_s1, 256 }
  0x42   :  { %p293_p13 = scmp.ne.s32.totalorder %s606_s1, %s292_s13  ;;  %p296_p0 = scmp.lt.u32.totalorder %s292_s13, %s606_s1 }
  0x44   :  { %p298_p1 = pnand %p296_p0, %p293_p13 }
  0x46   :  { %301 = shalt.err (!%p298_p1)
}
  0x47   :  { %s302_s18 = scalar_lea.vmem %s30_s24, 256  ;;  %p307_p3 = scmp.lt.s32.totalorder %s30_s24, %s30_s24 }
  0x48   :  { %p303_p2 = scmp.ne.s32.totalorder %s30_s24, %s302_s18  ;;  %p308_p4 = scmp.lt.s32.totalorder %s302_s18, %s302_s18 }
  0x4a   :  { %p309_p5 = por %p308_p4, %p307_p3 }
  0x4c   :  { %p310_p6 = pnand %p309_p5, %p303_p2 }
  0x4e   :  { %313 = shalt.err (!%p310_p6)
}
  0x4f   :  { %32 = dma.hbm_to_vmem [thread:$0]  %s606_s1, 256, %s30_s24, [#allocation5]  }
  0x50   :  { %s419_s19 = smov [#allocation9]   ;;  %s420_s21 = smov [#allocation12]  }
  0x51   :  { %s49_s20 = sshll.u32 %s419_s19, 4  ;;  %s71_s23 = sshll.u32 %s420_s21, 4  ;;  %s50_s20 = int_to_ptr.vmem [resolvable:$true] %s49_s20  ;;  %s72_s23 = int_to_ptr.vmem [resolvable:$true] %s71_s23 }
  0x52   :  { %s314_s0 = scalar_lea.hbm %s608_s3, 256 }
  0x53   :  { %p315_p7 = scmp.ne.s32.totalorder %s608_s3, %s314_s0  ;;  %p318_p8 = scmp.lt.u32.totalorder %s314_s0, %s608_s3 }
  0x55   :  { %p320_p9 = pnand %p318_p8, %p315_p7 }
  0x57   :  { %323 = shalt.err (!%p320_p9)
}
  0x58   :  { %s324_s1 = scalar_lea.vmem %s50_s20, 256  ;;  %p329_p11 = scmp.lt.s32.totalorder %s50_s20, %s50_s20 }
  0x59   :  { %p325_p10 = scmp.ne.s32.totalorder %s50_s20, %s324_s1  ;;  %p330_p12 = scmp.lt.s32.totalorder %s324_s1, %s324_s1 }
  0x5b   :  { %p331_p13 = por %p330_p12, %p329_p11 }
  0x5d   :  { %p332_p0 = pnand %p331_p13, %p325_p10 }
  0x5f   :  { %335 = shalt.err (!%p332_p0)
}
  0x60   :  { %52 = dma.hbm_to_vmem [thread:$0]  %s608_s3, 256, %s50_s20, [#allocation8]  }
  0x61   :  { %s336_s11 = scalar_lea.hbm %s611_s6, 256 }
  0x62   :  { %p337_p1 = scmp.ne.s32.totalorder %s611_s6, %s336_s11  ;;  %p340_p2 = scmp.lt.u32.totalorder %s336_s11, %s611_s6 }
  0x64   :  { %p342_p3 = pnand %p340_p2, %p337_p1 }
  0x66   :  { %345 = shalt.err (!%p342_p3)
}
  0x67   :  { %s346_s16 = scalar_lea.vmem %s72_s23, 256  ;;  %p351_p5 = scmp.lt.s32.totalorder %s72_s23, %s72_s23 }
  0x68   :  { %p347_p4 = scmp.ne.s32.totalorder %s72_s23, %s346_s16  ;;  %p352_p6 = scmp.lt.s32.totalorder %s346_s16, %s346_s16 }
  0x6a   :  { %p353_p7 = por %p352_p6, %p351_p5 }
  0x6c   :  { %p354_p8 = pnand %p353_p7, %p347_p4 }
  0x6e   :  { %357 = shalt.err (!%p354_p8)
}
  0x6f   :  { %74 = dma.hbm_to_vmem [thread:$0]  %s611_s6, 256, %s72_s23, [#allocation11]  }
  0x70   :  { %s421_s18 = smov [#allocation15]   ;;  %s358_s20 = scalar_lea.hbm %s613_s8, 256 }
  0x71   :  { %s91_s7 = sshll.u32 %s421_s18, 4  ;;  %p359_p9 = scmp.ne.s32.totalorder %s613_s8, %s358_s20  ;;  %s92_s7 = int_to_ptr.vmem [resolvable:$true] %s91_s7 }
  0x72   :  { %p362_p10 = scmp.lt.u32.totalorder %s358_s20, %s613_s8 }
  0x74   :  { %p364_p11 = pnand %p362_p10, %p359_p9 }
  0x76   :  { %367 = shalt.err (!%p364_p11)
}
  0x77   :  { %s368_s27 = scalar_lea.vmem %s92_s7, 256  ;;  %p373_p13 = scmp.lt.s32.totalorder %s92_s7, %s92_s7 }
  0x78   :  { %p369_p12 = scmp.ne.s32.totalorder %s92_s7, %s368_s27  ;;  %p374_p0 = scmp.lt.s32.totalorder %s368_s27, %s368_s27 }
  0x7a   :  { %p375_p1 = por %p374_p0, %p373_p13 }
  0x7c   :  { %p376_p2 = pnand %p375_p1, %p369_p12 }
  0x7e   :  { %379 = shalt.err (!%p376_p2)
}
  0x7f   :  { %94 = dma.hbm_to_vmem [thread:$0]  %s613_s8, 256, %s92_s7, [#allocation14]  }
  0x80   :  { %404 = dma.done.wait [#allocation5], 256  }
  0x81   :  { %405 = vsyncadd [#allocation5], 4294967040 }
  0x82   :  { %406 = dma.done.wait [#allocation8], 512  }
  0x83   :  { %407 = vsyncadd [#allocation8], 4294966784 }
  0x84   :  { %408 = dma.done.wait [#allocation11], 512  }
  0x85   :  { %409 = vsyncadd [#allocation11], 4294966784 }
  0x86   :  { %410 = dma.done.wait [#allocation14], 512  }
  0x87   :  { %411 = vsyncadd [#allocation14], 4294966784  ;;  %s116_s28 = sld [smem:[#allocation3]]  ;;  %s200_s29 = sld [smem:[#allocation3 + $0x1]]  ;;  %v117_v0 = vld [vmem:[#allocation4] sm:$0xff]  ;;  %v123_v2 = vld [vmem:[#allocation7] sm:$0xff] }
  0x88   :  { %s569_s30 = sld [smem:[#allocation3 + $0x2]]  ;;  %s571_s1 = sld [smem:[#allocation3 + $0x3]]  ;;  %v131_v4 = vld [vmem:[#allocation9] sm:$0xff]  ;;  %v139_v8 = vld [vmem:[#allocation10] sm:$0xff]  ;;  %v118_v13 = vld [vmem:[#allocation4 + $0x8] sm:$0xff] }
  0x89   :  { %s573_s24 = sld [smem:[#allocation3 + $0x4]]  ;;  %s575_s8 = sld [smem:[#allocation3 + $0x5]]  ;;  %v147_v11 = vld [vmem:[%s610_s5] sm:$0xff]  ;;  %v124_v16 = vld [vmem:[#allocation7 + $0x8] sm:$0xff]  ;;  %v132_v17 = vld [vmem:[#allocation9 + $0x8] sm:$0xff] }
  0x8a   :  { %s577_s4 = sld [smem:[#allocation3 + $0x6]]  ;;  %s579_s22 = sld [smem:[#allocation3 + $0x7]]  ;;  %v140_v18 = vld [vmem:[#allocation10 + $0x8] sm:$0xff]  ;;  %v155_v19 = vld [vmem:[#allocation12] sm:$0xff]  ;;  %v163_v27 = vld [vmem:[#allocation13] sm:$0xff] }
  0x8b   :  { %v148_v26 = vld [vmem:[%s610_s5 + $0x8] sm:$0xff]  ;;  %v156_v33 = vld [vmem:[#allocation12 + $0x8] sm:$0xff]  ;;  %v171_v34 = vld [vmem:[#allocation15] sm:$0xff]  ;;  %s422_s5 = smov [#allocation16]  }
  0x8c   :  { %v164_v40 = vld [vmem:[#allocation13 + $0x8] sm:$0xff]  ;;  %v172_v45 = vld [vmem:[#allocation15 + $0x8] sm:$0xff]  ;;  %s188_s14 = sshll.u32 %s422_s5, 4  ;;  %s189_s14 = int_to_ptr.vmem [resolvable:$true] %s188_s14 }
  0x8d   :  { %v119_v1 = vstv %s116_s28  ;;  %v125_v3 = vstv %s200_s29  ;;  %s380_s15 = scalar_lea.vmem %s189_s14, 256  ;;  %p385_p4 = scmp.lt.s32.totalorder %s189_s14, %s189_s14 }
  0x8e   :  { %v120_v5 = vmul.f32 %v119_v1, %v117_v0  ;;  %v126_v6 = vmul.f32 %v125_v3, %v123_v2  ;;  %v133_v7 = vstv %s569_s30  ;;  %v141_v9 = vstv %s571_s1  ;;  %p381_p3 = scmp.ne.s32.totalorder %s189_s14, %s380_s15  ;;  %p386_p5 = scmp.lt.s32.totalorder %s380_s15, %s380_s15 }
  0x8f   :  { %v134_v10 = vmul.f32 %v133_v7, %v131_v4  ;;  %v149_v12 = vstv %s573_s24  ;;  %v142_v15 = vmul.f32 %v141_v9, %v139_v8  ;;  %v157_v20 = vstv %s575_s8 }
  0x90   :  { %v128_v14 = vadd.f32 %v126_v6, %v120_v5  ;;  %v121_v21 = vmul.f32 %v119_v1, %v118_v13  ;;  %v127_v22 = vmul.f32 %v125_v3, %v124_v16  ;;  %v150_v24 = vmul.f32 %v149_v12, %v147_v11  ;;  %p387_p6 = por %p386_p5, %p385_p4 }
  0x91   :  { %v135_v25 = vmul.f32 %v133_v7, %v132_v17  ;;  %v165_v28 = vstv %s577_s4  ;;  %v143_v30 = vmul.f32 %v141_v9, %v140_v18  ;;  %v158_v32 = vmul.f32 %v157_v20, %v155_v19 }
  0x92   :  { %v136_v23 = vadd.f32 %v134_v10, %v128_v14  ;;  %v129_v29 = vadd.f32 %v127_v22, %v121_v21  ;;  %v173_v35 = vstv %s579_s22  ;;  %v151_v37 = vmul.f32 %v149_v12, %v148_v26  ;;  %p388_p7 = pnand %p387_p6, %p381_p3 }
  0x93   :  { %v166_v39 = vmul.f32 %v165_v28, %v163_v27  ;;  %v159_v42 = vmul.f32 %v157_v20, %v156_v33  ;;  %v174_v44 = vmul.f32 %v173_v35, %v171_v34  ;;  %v167_v47 = vmul.f32 %v165_v28, %v164_v40 }
  0x94   :  { %v144_v31 = vadd.f32 %v142_v15, %v136_v23  ;;  %v137_v36 = vadd.f32 %v135_v25, %v129_v29  ;;  %v175_v50 = vmul.f32 %v173_v35, %v172_v45 }
  0x96   :  { %v152_v38 = vadd.f32 %v150_v24, %v144_v31  ;;  %v145_v41 = vadd.f32 %v143_v30, %v137_v36 }
  0x98   :  { %v160_v43 = vadd.f32 %v158_v32, %v152_v38  ;;  %v153_v46 = vadd.f32 %v151_v37, %v145_v41 }
  0x9a   :  { %v168_v48 = vadd.f32 %v166_v39, %v160_v43  ;;  %v161_v49 = vadd.f32 %v159_v42, %v153_v46 }
  0x9c   :  { %v176_v51 = vadd.f32 %v174_v44, %v168_v48  ;;  %v169_v52 = vadd.f32 %v167_v47, %v161_v49 }
  0x9e   :  { %v178_v53 = vmax.f32 %v176_v51, 0.0  ;;  %v177_v54 = vadd.f32 %v175_v50, %v169_v52 }
  0xa0   :  { %180 = vst [vmem:[#allocation16] sm:$0xff] %v178_v53  ;;  %v179_v55 = vmax.f32 %v177_v54, 0.0 }
  0xa2   :  { %181 = vst [vmem:[#allocation16 + $0x8] sm:$0xff] %v179_v55 }
  0xa3   :  { %391 = shalt.err (!%p388_p7)
}
  0xa4   :  { %s392_s17 = scalar_lea.hbm %s614_s9, 256 }
  0xa5   :  { %p393_p8 = scmp.ne.s32.totalorder %s614_s9, %s392_s17  ;;  %p396_p9 = scmp.lt.u32.totalorder %s392_s17, %s614_s9 }
  0xa7   :  { %p398_p10 = pnand %p396_p9, %p393_p8 }
  0xa9   :  { %401 = shalt.err (!%p398_p10)
}
  0xaa   :  { %191 = dma.vmem_to_hbm [thread:$0]  %s189_s14, 256, %s614_s9, [#allocation6]  }
  0xab   :  { %412 = dma.done.wait [#allocation6], 256  }
  0xac   :  { %413 = vsyncadd [#allocation6], 4294967040 }
  0xad   :  { %195 = vsyncpa [#allocation5], 1 }
  0xae   :  { %196 = vsyncpa [#allocation8], 1 }
  0xaf   :  { %197 = vsyncpa [#allocation11], 1 }
  0xb0   :  { %198 = vsyncpa [#allocation14], 1 }
  0xb1   :  { %199 = vsyncpa [#allocation6], 1 }

</bundles_post_ra>
